<compile_context>
chip_gen: v7x
topology: tpu7x:2x2x1
jax: 0.10.0
libtpu: 0.0.40
codegen_flags: <defaults>
</compile_context>

<pallas_src>
import functools

import jax
import jax.numpy as jnp
from jax.experimental import pallas as pl
from jax.experimental.pallas import tpu as pltpu


# ----------------------------------------------------------------------------
# Hardware-aware sizing helpers
# ----------------------------------------------------------------------------
@functools.lru_cache(maxsize=None)
def _vmem_limit_bytes():
    cap = 128 * 1024 * 1024
    try:
        info = pltpu.get_tpu_info()
        cap = int(getattr(info, "vmem_capacity_bytes", cap))
    except Exception:
        pass
    # ~3/4 of physical VMEM, capped: ≈96 MiB on v5e/v6e (128 MiB), ≈48 MiB on
    # v7x (64 MiB) — leaves headroom for compiler scratch and double buffers.
    return max(32 * 1024 * 1024, min((cap * 3) // 4, 96 * 1024 * 1024))


def _sublane_align(dtype):
    # native sublane tile: 8 rows f32, 16 rows bf16, 32 rows int8/fp8
    return max(8, 32 // jnp.dtype(dtype).itemsize)


def _pick_tile(dim, target, align):
    """Largest multiple of `align` <= `target` that divides `dim`; else full dim."""
    if dim <= target:
        return dim
    t = (min(target, dim) // align) * align
    while t >= align:
        if dim % t == 0:
            return t
        t -= align
    return dim


def _linear_tiles(M, N, K, dtype):
    """Pick (tm, tn, tk) that fit a fraction of the per-chip VMEM budget."""
    budget = (_vmem_limit_bytes() * 3) // 5
    isz = jnp.dtype(dtype).itemsize
    am = _sublane_align(dtype)
    tm_t, tn_t, tk_t = 1024, 512, 512
    tm = tn = tk = None
    for _ in range(24):
        tm = _pick_tile(M, tm_t, am)
        tn = _pick_tile(N, tn_t, 128)
        tk = _pick_tile(K, tk_t, 128)
        # double-buffered x/w/out/bias tiles + f32 accumulator
        footprint = 2 * (tm * tk + tk * tn + tm * tn + tn) * isz + tm * tn * 4
        if footprint <= budget:
            break
        if tm_t > am and tm >= max(tn, tk):
            tm_t //= 2
        elif tk_t > 128 and tk >= tn:
            tk_t //= 2
        elif tn_t > 128:
            tn_t //= 2
        else:
            # TODO(synk): pad-and-mask fallback for dims with no aligned divisor.
            break
    return tm, tn, tk


def _sr_tiles(M, K, C, dtype):
    budget = (_vmem_limit_bytes() * 3) // 5
    isz = jnp.dtype(dtype).itemsize
    am = _sublane_align(dtype)
    tm_t, tk_t = 512, 512
    tm = tk = None
    for _ in range(16):
        tm = _pick_tile(M, tm_t, am)
        tk = _pick_tile(K, tk_t, 128)
        footprint = 2 * (tm * tk + tk * C + tm * C + 3 * C) * isz + tm * C * 4
        if footprint <= budget:
            break
        if tm_t > am and tm >= tk:
            tm_t //= 2
        elif tk_t > 128:
            tk_t //= 2
        else:
            break
    return tm, tk


# ----------------------------------------------------------------------------
# Tiled linear:  out = x @ w + b     grid = (M/tm, N/tn, K/tk), f32 accumulator
# ----------------------------------------------------------------------------
def _linear_kernel(x_ref, w_ref, b_ref, o_ref, acc_ref):
    k = pl.program_id(2)

    @pl.when(k == 0)
    def _():
        acc_ref[...] = jnp.zeros_like(acc_ref)

    acc_ref[...] += jnp.dot(x_ref[...], w_ref[...],
                            preferred_element_type=jnp.float32)

    @pl.when(k == pl.num_programs(2) - 1)
    def _():
        o_ref[...] = (acc_ref[...] + b_ref[...].astype(jnp.float32)
                      ).astype(o_ref.dtype)


def pallas_linear(x2d, w, b):
    M, K = x2d.shape
    Kw, Nout = w.shape
    assert K == Kw
    tm, tn, tk = _linear_tiles(M, Nout, K, x2d.dtype)
    grid = (M // tm, Nout // tn, K // tk)
    return pl.pallas_call(
        _linear_kernel,
        out_shape=jax.ShapeDtypeStruct((M, Nout), x2d.dtype),
        grid=grid,
        in_specs=[
            pl.BlockSpec((tm, tk), lambda i, j, k: (i, k)),
            pl.BlockSpec((tk, tn), lambda i, j, k: (k, j)),
            pl.BlockSpec((1, tn), lambda i, j, k: (0, j)),
        ],
        out_specs=pl.BlockSpec((tm, tn), lambda i, j, k: (i, j)),
        scratch_shapes=[pltpu.VMEM((tm, tn), jnp.float32)],
        compiler_params=pltpu.CompilerParams(
            dimension_semantics=("parallel", "parallel", "arbitrary"),
            vmem_limit_bytes=_vmem_limit_bytes(),
        ),
    )(x2d, w, b.reshape(1, Nout))


# ----------------------------------------------------------------------------
# Fused spatial-reduction conv (as matmul) + bias + LayerNorm epilogue
# grid = (M/tm, K/tk); full C stays resident so LN over C runs on the acc tile.
# ----------------------------------------------------------------------------
def _sr_ln_kernel(x_ref, w_ref, b_ref, g_ref, beta_ref, o_ref, acc_ref):
    k = pl.program_id(1)

    @pl.when(k == 0)
    def _():
        acc_ref[...] = jnp.zeros_like(acc_ref)

    acc_ref[...] += jnp.dot(x_ref[...], w_ref[...],
                            preferred_element_type=jnp.float32)

    @pl.when(k == pl.num_programs(1) - 1)
    def _():
        y = acc_ref[...] + b_ref[...].astype(jnp.float32)
        mu = jnp.mean(y, axis=-1, keepdims=True)
        var = jnp.mean((y - mu) * (y - mu), axis=-1, keepdims=True)
        yn = (y - mu) * jax.lax.rsqrt(var + 1e-5)   # torch LayerNorm: biased var, eps=1e-5
        o_ref[...] = (yn * g_ref[...].astype(jnp.float32)
                      + beta_ref[...].astype(jnp.float32)).astype(o_ref.dtype)


def pallas_sr_layernorm(patches, wsr, bsr, gamma, beta, out_dtype):
    M, K = patches.shape
    Kw, C = wsr.shape
    assert K == Kw
    tm, tk = _sr_tiles(M, K, C, patches.dtype)
    grid = (M // tm, K // tk)
    return pl.pallas_call(
        _sr_ln_kernel,
        out_shape=jax.ShapeDtypeStruct((M, C), out_dtype),
        grid=grid,
        in_specs=[
            pl.BlockSpec((tm, tk), lambda i, k: (i, k)),
            pl.BlockSpec((tk, C), lambda i, k: (k, 0)),
            pl.BlockSpec((1, C), lambda i, k: (0, 0)),
            pl.BlockSpec((1, C), lambda i, k: (0, 0)),
            pl.BlockSpec((1, C), lambda i, k: (0, 0)),
        ],
        out_specs=pl.BlockSpec((tm, C), lambda i, k: (i, 0)),
        scratch_shapes=[pltpu.VMEM((tm, C), jnp.float32)],
        compiler_params=pltpu.CompilerParams(
            dimension_semantics=("parallel", "arbitrary"),
            vmem_limit_bytes=_vmem_limit_bytes(),
        ),
    )(patches, wsr, bsr.reshape(1, C), gamma.reshape(1, C), beta.reshape(1, C))


# ----------------------------------------------------------------------------
# Multi-head attention with fused output projection.
# One grid step = (output batch b, query tile qi): all heads of a (tq, C)
# block, softmax per head, heads assembled in a (tq, C) f32 VMEM scratch, then
# the proj matmul + bias run in the epilogue and a single lane-dense (tq, C)
# block is stored.  Which q batch / kv batch feed output batch b comes from
# scalar-prefetch index arrays, so cross-domain pairings need no duplication.
# k/v stay fused inside kvsrc (lane offsets k_off / v_off); when
# sr_ratio == 1, qsrc and kvsrc are the SAME fused qkv array.
# ----------------------------------------------------------------------------
def _mha_proj_kernel(qix_ref, kix_ref, qsrc_ref, kvsrc_ref, wp_ref, bp_ref,
                     o_ref, acc_ref, *, num_heads, scale, dim, q_off, k_off, v_off):
    del qix_ref, kix_ref          # only consumed by the index_maps
    hd = dim // num_heads
    qs = qsrc_ref[...]            # (tq, Cq_src)
    kv = kvsrc_ref[...]           # (Nk, Ckv_src)
    # scale hoisted onto q: one (tq, C) multiply instead of heads x (tq, Nk)
    q_all = qs[:, q_off:q_off + dim] * scale
    k_all = kv[:, k_off:k_off + dim]
    v_all = kv[:, v_off:v_off + dim]
    for h in range(num_heads):    # static, small; per-head softmax
        sl = slice(h * hd, (h + 1) * hd)
        qh, kh, vh = q_all[:, sl], k_all[:, sl], v_all[:, sl]
        s = jax.lax.dot_general(qh, kh, (((1,), (1,)), ((), ())),
                                preferred_element_type=jnp.float32)
        s = s - jnp.max(s, axis=-1, keepdims=True)
        p = jnp.exp(s)
        inv = pl.reciprocal(jnp.sum(p, axis=-1, keepdims=True), approx=True)
        oh = jnp.dot(p.astype(vh.dtype), vh, preferred_element_type=jnp.float32)
        acc_ref[:, sl] = oh * inv          # per-head lane-slice write (no concat)
    # Fused output projection epilogue on the f32 tile.
    y = acc_ref[...]
    wp = wp_ref[...]
    if wp.dtype != jnp.float32:
        y = y.astype(wp.dtype)
    out = (jnp.dot(y, wp, preferred_element_type=jnp.float32)
           + bp_ref[...].astype(jnp.float32))
    o_ref[...] = out.astype(o_ref.dtype)


def pallas_mha_proj(qsrc, kvsrc, wproj, bproj, q_idx, kv_idx, num_heads, scale,
                    q_off, k_off, v_off, *, tq_target=256):
    # qsrc: (Bq, Nq, Cq_src), kvsrc: (Bk, Nk, Ckv_src); output batch b uses
    # qsrc[q_idx[b]] and kvsrc[kv_idx[b]].  Output already projected.
    # TODO(synk): flash-style Nk tiling (running max/sum/acc) or reduced K/V
    # buffering for very long key sequences so K/V residency fits v7x's 64 MiB.
    Bq, Nq, Cq = qsrc.shape
    Bk, Nk, Ckv = kvsrc.shape
    C = wproj.shape[0]
    Bout = int(q_idx.shape[0])
    tq = _pick_tile(Nq, tq_target, _sublane_align(qsrc.dtype))
    grid = (Bout, Nq // tq)
    kernel = functools.partial(
        _mha_proj_kernel, num_heads=num_heads, scale=float(scale), dim=C,
        q_off=q_off, k_off=k_off, v_off=v_off)
    return pl.pallas_call(
        kernel,
        out_shape=jax.ShapeDtypeStruct((Bout, Nq, C), qsrc.dtype),
        grid_spec=pltpu.PrefetchScalarGridSpec(
            num_scalar_prefetch=2,
            grid=grid,
            in_specs=[
                pl.BlockSpec((None, tq, Cq), lambda b, qi, qix, kix: (qix[b], qi, 0)),
                pl.BlockSpec((None, Nk, Ckv), lambda b, qi, qix, kix: (kix[b], 0, 0)),
                # wproj/bproj: constant block index -> fetched once, never re-DMA'd
                pl.BlockSpec((C, C), lambda b, qi, qix, kix: (0, 0)),
                pl.BlockSpec((1, C), lambda b, qi, qix, kix: (0, 0)),
            ],
            out_specs=pl.BlockSpec((None, tq, C), lambda b, qi, qix, kix: (b, qi, 0)),
            scratch_shapes=[pltpu.VMEM((tq, C), jnp.float32)],
        ),
        compiler_params=pltpu.CompilerParams(
            dimension_semantics=("parallel", "parallel"),
            vmem_limit_bytes=_vmem_limit_bytes(),
        ),
    )(q_idx, kv_idx, qsrc, kvsrc, wproj, bproj.reshape(1, C))


# ----------------------------------------------------------------------------
# Parameters (matching nn.Linear / nn.Conv2d / nn.LayerNorm of the module)
# ----------------------------------------------------------------------------
def make_params(dim, num_heads, sr_ratio, qkv_bias=False, qk_scale=None,
                seed=0, dtype=jnp.float32):
    assert dim % num_heads == 0
    key = jax.random.PRNGKey(seed)
    ks = jax.random.split(key, 8)
    hd = dim // num_heads
    s = 0.1
    params = dict(
        dim=dim,
        num_heads=num_heads,
        sr_ratio=sr_ratio,
        scale=(qk_scale if qk_scale is not None else hd ** (-0.5)),
        wq=(s * jax.random.normal(ks[0], (dim, dim))).astype(dtype),
        bq=((s * jax.random.normal(ks[1], (dim,))).astype(dtype)
            if qkv_bias else jnp.zeros((dim,), dtype)),
        wkv=(s * jax.random.normal(ks[2], (dim, 2 * dim))).astype(dtype),
        bkv=((s * jax.random.normal(ks[3], (2 * dim,))).astype(dtype)
             if qkv_bias else jnp.zeros((2 * dim,), dtype)),
        wproj=(s * jax.random.normal(ks[4], (dim, dim))).astype(dtype),
        bproj=(s * jax.random.normal(ks[5], (dim,))).astype(dtype),
    )
    if sr_ratio > 1:
        r = sr_ratio
        # nn.Conv2d(dim, dim, kernel_size=r, stride=r): weight (out, in, kh, kw)
        w_conv = s * jax.random.normal(ks[6], (dim, dim, r, r))
        # matmul form, rows ordered (kh, kw, in_ch) to match the C-innermost im2col
        params["wsr"] = jnp.transpose(w_conv, (2, 3, 1, 0)).reshape(r * r * dim, dim).astype(dtype)
        params["bsr"] = (s * jax.random.normal(ks[7], (dim,))).astype(dtype)
        params["ln_g"] = jnp.ones((dim,), dtype)
        params["ln_b"] = jnp.zeros((dim,), dtype)
    return params


# ----------------------------------------------------------------------------
# JAX glue (no head split/merge transposes; heads stay concatenated on C;
# k/v stay fused; proj fused into attention)
# ----------------------------------------------------------------------------
def _im2col(x, H, W, r):
    """(B, N, C) -> (B*oh*ow, r*r*C) with C innermost (cheap relayout)."""
    B, N, C = x.shape
    x_blk = x.reshape(B, H // r, r, W // r, r, C)
    patches = jnp.transpose(x_blk, (0, 1, 3, 2, 4, 5))   # (B, oh, ow, kh, kw, C)
    Nk = (H // r) * (W // r)
    return patches.reshape(B * Nk, r * r * C), Nk


def _sr_reduce(params, x, H, W):
    B, N, C = x.shape
    r = params["sr_ratio"]
    patches, Nk = _im2col(x, H, W, r)
    x_ = pallas_sr_layernorm(patches, params["wsr"], params["bsr"],
                             params["ln_g"], params["ln_b"], x.dtype)
    return x_.reshape(B, Nk, C)


def _qkv_sources(params, x, H, W):
    """Returns (qsrc, kvsrc, q_off, k_off, v_off); k/v never split in HBM."""
    B, N, C = x.shape
    if params["sr_ratio"] > 1:
        q = pallas_linear(x.reshape(B * N, C), params["wq"], params["bq"]).reshape(B, N, C)
        x_ = _sr_reduce(params, x, H, W)
        Nk = x_.shape[1]
        kv = pallas_linear(x_.reshape(B * Nk, C), params["wkv"],
                           params["bkv"]).reshape(B, Nk, 2 * C)
        return q, kv, 0, 0, C
    # sr_ratio == 1: one fused (C, 3C) projection; feed the 3C output straight
    # into the attention kernel (q/k/v selected by lane offsets inside).
    wqkv = jnp.concatenate([params["wq"], params["wkv"]], axis=1)
    bqkv = jnp.concatenate([params["bq"], params["bkv"]], axis=0)
    qkv = pallas_linear(x.reshape(B * N, C), wqkv, bqkv).reshape(B, N, 3 * C)
    return qkv, qkv, 0, C, 2 * C


def forward_standard(params, x, H, W):
    B, N, C = x.shape
    qsrc, kvsrc, qo, ko, vo = _qkv_sources(params, x, H, W)
    idx = jnp.arange(B, dtype=jnp.int32)
    return pallas_mha_proj(qsrc, kvsrc, params["wproj"], params["bproj"],
                           idx, idx, params["num_heads"], params["scale"],
                           qo, ko, vo)


def forward_crossdomain(params, xs, xt, xts, H, W):
    # torch.no_grad / .detach only affect autograd, not forward values.
    B, N, C = xs.shape
    x_all = jnp.concatenate([xs, xt, xts], axis=0)             # (3B, N, C): [s | t | ts]
    qsrc, kvsrc, qo, ko, vo = _qkv_sources(params, x_all, H, W)  # one q(/qkv), one SR, one kv

    b = jnp.arange(B, dtype=jnp.int32)
    # Per-b interleaving [s, ts2, t, ts1]: consecutive output batches share the
    # kv block index (s & ts2 use kvs; ts2 & t share the q batch), so the
    # pipeline skips ~25% of K/V DMAs.
    q_idx = jnp.stack([b, B + b, B + b, 2 * B + b], axis=1).reshape(-1)
    kv_idx = jnp.stack([b, b, B + b, 2 * B + b], axis=1).reshape(-1)

    out = pallas_mha_proj(qsrc, kvsrc, params["wproj"], params["bproj"],
                          q_idx, kv_idx, params["num_heads"], params["scale"],
                          qo, ko, vo)                          # (4B, N, C) already projected
    o4 = out.reshape(B, 4, N, C)
    xs_o = o4[:, 0]
    xt_o = o4[:, 2]
    # proj is affine => proj(0.5*(a+b)) == 0.5*(proj(a)+proj(b)); mix post-proj.
    xts_o = 0.5 * (o4[:, 3] + o4[:, 1])
    return xs_o, xt_o, xts_o


def memcd_attention_forward(params, x, H, W):
    if isinstance(x, tuple):
        return forward_crossdomain(params, x[0], x[1], x[2], H, W)
    return forward_standard(params, x, H, W)


# ----------------------------------------------------------------------------
# Pure-JAX reference (for correctness check only)
# ----------------------------------------------------------------------------
def _ref_linear(x, w, b):
    return x @ w + b


def _ref_sr(params, x, H, W):
    B, N, C = x.shape
    r = params["sr_ratio"]
    patches, Nk = _im2col(x, H, W, r)
    y = patches @ params["wsr"] + params["bsr"]
    mu = y.mean(-1, keepdims=True)
    var = ((y - mu) ** 2).mean(-1, keepdims=True)
    y = (y - mu) / jnp.sqrt(var + 1e-5) * params["ln_g"] + params["ln_b"]
    return y.reshape(B, Nk, C)


def _ref_attention(params, q, k, v):
    B, N, C = q.shape
    nh = params["num_heads"]
    hd = C // nh
    qh = q.reshape(B, N, nh, hd).transpose(0, 2, 1, 3)
    kh = k.reshape(B, -1, nh, hd).transpose(0, 2, 1, 3)
    vh = v.reshape(B, -1, nh, hd).transpose(0, 2, 1, 3)
    s = jnp.einsum("bhqd,bhkd->bhqk", qh, kh) * params["scale"]
    p = jax.nn.softmax(s, axis=-1)
    o = jnp.einsum("bhqk,bhkd->bhqd", p, vh)
    return o.transpose(0, 2, 1, 3).reshape(B, N, C)


def reference_forward(params, x, H, W):
    C = params["dim"]

    def kvf(z):
        z_ = _ref_sr(params, z, H, W) if params["sr_ratio"] > 1 else z
        kv = _ref_linear(z_, params["wkv"], params["bkv"])
        return kv[..., :C], kv[..., C:]

    def qf(z):
        return _ref_linear(z, params["wq"], params["bq"])

    def pr(z):
        return _ref_linear(z, params["wproj"], params["bproj"])

    if isinstance(x, tuple):
        xs, xt, xts = x
        qts, qs, qt = qf(xts), qf(xs), qf(xt)
        kts, vts = kvf(xts)
        ks, vs = kvf(xs)
        kt, vt = kvf(xt)
        xts1 = _ref_attention(params, qts, kts, vts)
        xs_o = _ref_attention(params, qs, ks, vs)
        xt_o = _ref_attention(params, qt, kt, vt)
        xts2 = _ref_attention(params, qt, ks, vs)
        xts_m = 0.5 * (xts1 + xts2)
        return pr(xs_o), pr(xt_o), pr(xts_m)
    q = qf(x)
    k, v = kvf(x)
    o = _ref_attention(params, q, k, v)
    return pr(o)


# ----------------------------------------------------------------------------
if __name__ == "__main__":
    # Small shapes consistent with the module: dim=32, 8 heads.
    B, H, W, C = 2, 8, 8, 32
    N = H * W
    num_heads = 8

    key = jax.random.PRNGKey(0)
    k1, k2, k3 = jax.random.split(key, 3)
    xs = jax.random.normal(k1, (B, N, C), jnp.float32)
    xt = jax.random.normal(k2, (B, N, C), jnp.float32)
    xts = jax.random.normal(k3, (B, N, C), jnp.float32)

    def _check(a, b, shape):
        assert a.shape == shape
        assert jnp.allclose(a, b, atol=2e-3, rtol=2e-2), \
            float(jnp.max(jnp.abs(a - b)))

    for sr_ratio in (2, 1):
        params = make_params(C, num_heads, sr_ratio, qkv_bias=False, seed=sr_ratio)

        # standard path
        out_std = memcd_attention_forward(params, xs, H, W)
        jax.block_until_ready(out_std)
        ref_std = reference_forward(params, xs, H, W)
        _check(out_std, ref_std, (B, N, C))

        # cross-domain path
        out_s, out_t, out_ts = memcd_attention_forward(params, (xs, xt, xts), H, W)
        jax.block_until_ready((out_s, out_t, out_ts))
        ref_s, ref_t, ref_ts = reference_forward(params, (xs, xt, xts), H, W)
        for o, r in ((out_s, ref_s), (out_t, ref_t), (out_ts, ref_ts)):
            _check(o, r, (B, N, C))

    print("KERNEL_OK")
</pallas_src>

<mosaic_0001>
module attributes {stable_mosaic.version = 11 : i64} {
  func.func @_linear_kernel(%arg0: i32, %arg1: i32, %arg2: i32, %arg3: memref<128x32xf32, #tpu.memory_space<vmem>>, %arg4: memref<32x32xf32, #tpu.memory_space<vmem>>, %arg5: memref<1x32xf32, #tpu.memory_space<vmem>>, %arg6: memref<128x32xf32, #tpu.memory_space<vmem>>, %arg7: memref<128x32xf32, #tpu.memory_space<vmem>>) attributes {dimension_semantics = [#tpu.dimension_semantics<parallel>, #tpu.dimension_semantics<parallel>, #tpu.dimension_semantics<arbitrary>], iteration_bounds = array<i64: 1, 1, 1>, scalar_prefetch = 0 : i64, scratch_operands = 1 : i64, tpu.core_type = #tpu.core_type<tc>, window_params = [{transform_indices = @transform_0, window_bounds = array<i64: 128, 32>}, {transform_indices = @transform_1, window_bounds = array<i64: 32, 32>}, {transform_indices = @transform_2, window_bounds = array<i64: 1, 32>}, {transform_indices = @transform_3, window_bounds = array<i64: 128, 32>}]} {
    %c0_i32 = arith.constant 0 : i32
    %0 = arith.cmpi eq, %arg2, %c0_i32 : i32
    %1 = arith.extui %0 : i1 to i32
    %c0_i32_0 = arith.constant 0 : i32
    %2 = arith.cmpi ne, %1, %c0_i32_0 : i32
    scf.if %2 {
      %cst_10 = arith.constant 0.000000e+00 : f32
      %12 = vector.broadcast %cst_10 : f32 to vector<128x32xf32>
      %c0_11 = arith.constant 0 : index
      %c0_12 = arith.constant 0 : index
      %13 = vector.load %arg7[%c0_11, %c0_12] : memref<128x32xf32, #tpu.memory_space<vmem>>, vector<128x32xf32>
      tpu.vector_store %arg7[%c0_11, %c0_12], %12 {strides = array<i32>} : memref<128x32xf32, #tpu.memory_space<vmem>>, vector<128x32xf32>,
    } else {
    }
    %c0 = arith.constant 0 : index
    %c0_1 = arith.constant 0 : index
    %3 = vector.load %arg7[%c0, %c0_1] : memref<128x32xf32, #tpu.memory_space<vmem>>, vector<128x32xf32>
    %c0_2 = arith.constant 0 : index
    %c0_3 = arith.constant 0 : index
    %4 = vector.load %arg3[%c0_2, %c0_3] : memref<128x32xf32, #tpu.memory_space<vmem>>, vector<128x32xf32>
    %c0_4 = arith.constant 0 : index
    %c0_5 = arith.constant 0 : index
    %5 = vector.load %arg4[%c0_4, %c0_5] : memref<32x32xf32, #tpu.memory_space<vmem>>, vector<32x32xf32>
    %cst = arith.constant dense<0.000000e+00> : vector<128x32xf32>
    %6 = tpu.matmul %4, %5, %cst {dimension_numbers = #tpu.dot_dimension_numbers<[1], [0], [0], [1], [0, 0, 1, 1], [], []>} : vector<128x32xf32>, vector<32x32xf32>, vector<128x32xf32> -> vector<128x32xf32>
    %7 = arith.addf %3, %6 : vector<128x32xf32>
    %c0_6 = arith.constant 0 : index
    %c0_7 = arith.constant 0 : index
    %8 = vector.load %arg7[%c0_6, %c0_7] : memref<128x32xf32, #tpu.memory_space<vmem>>, vector<128x32xf32>
    tpu.vector_store %arg7[%c0_6, %c0_7], %7 {strides = array<i32>} : memref<128x32xf32, #tpu.memory_space<vmem>>, vector<128x32xf32>,
    %c0_i32_8 = arith.constant 0 : i32
    %9 = arith.cmpi eq, %arg2, %c0_i32_8 : i32
    %10 = arith.extui %9 : i1 to i32
    %c0_i32_9 = arith.constant 0 : i32
    %11 = arith.cmpi ne, %10, %c0_i32_9 : i32
    scf.if %11 {
      %c0_10 = arith.constant 0 : index
      %c0_11 = arith.constant 0 : index
      %12 = vector.load %arg7[%c0_10, %c0_11] : memref<128x32xf32, #tpu.memory_space<vmem>>, vector<128x32xf32>
      %c0_12 = arith.constant 0 : index
      %c0_13 = arith.constant 0 : index
      %13 = vector.load %arg5[%c0_12, %c0_13] : memref<1x32xf32, #tpu.memory_space<vmem>>, vector<1x32xf32>
      %14 = vector.broadcast %13 : vector<1x32xf32> to vector<128x32xf32>
      %15 = arith.addf %12, %14 : vector<128x32xf32>
      %c0_14 = arith.constant 0 : index
      %c0_15 = arith.constant 0 : index
      %16 = vector.load %arg6[%c0_14, %c0_15] : memref<128x32xf32, #tpu.memory_space<vmem>>, vector<128x32xf32>
      tpu.vector_store %arg6[%c0_14, %c0_15], %15 {strides = array<i32>} : memref<128x32xf32, #tpu.memory_space<vmem>>, vector<128x32xf32>,
    } else {
    }
    return
  }
  func.func @transform_0(%arg0: i32, %arg1: i32, %arg2: i32) -> (i32, i32) {
    %c0_i32 = arith.constant 0 : i32
    return %arg0, %arg2 : i32, i32
  }
  func.func @transform_1(%arg0: i32, %arg1: i32, %arg2: i32) -> (i32, i32) {
    %c0_i32 = arith.constant 0 : i32
    return %arg2, %arg1 : i32, i32
  }
  func.func @transform_2(%arg0: i32, %arg1: i32, %arg2: i32) -> (i32, i32) {
    %c0_i32 = arith.constant 0 : i32
    %c0_i32_0 = arith.constant 0 : i32
    return %c0_i32, %arg1 : i32, i32
  }
  func.func @transform_3(%arg0: i32, %arg1: i32, %arg2: i32) -> (i32, i32) {
    %c0_i32 = arith.constant 0 : i32
    return %arg0, %arg1 : i32, i32
  }
}

</mosaic_0001>

<bundles_post_ra>
// kernel: tpu_custom_call.1
= control target key start
LH: loop header
LB: loop body
LE: loop exit
PB: predicated region body
PF: predicated region fallthrough
CT: control target
= control target key end

     0   :  { %8 = vsyncpa [#allocation4], 0  ;;  %s768_s0 = inlined_call_operand.hbm [shape: f32[128,32], index: 0, kind: input, shape index: {}]   ;;  %s769_s1 = inlined_call_operand.hbm [shape: f32[32,32], index: 1, kind: input, shape index: {}]   ;;  %s770_s2 = inlined_call_operand.hbm [shape: f32[1,32], index: 2, kind: input, shape index: {}]   ;;  %s771_s3 = inlined_call_operand.hbm [shape: f32[128,32], index: 3, kind: output, shape index: {}]  }
   0x1   :  { %9 = vsyncpa [#allocation7], 0 }
   0x2   :  { %10 = vsyncpa [#allocation5], 0  ;;  %s595_s12 = smov [#allocation6]   ;;  %s596_s14 = smov [#allocation3]  }
   0x3   :  { %s28_s13 = sshll.u32 %s595_s12, 4  ;;  %s16_s15 = sshll.u32 %s596_s14, 4  ;;  %s29_s13 = int_to_ptr.vmem [resolvable:$true] %s28_s13  ;;  %s622_s15 = int_to_ptr.vmem [resolvable:$true] %s16_s15 }
   0x4   :  { %s501_s18 = scalar_lea.hbm %s769_s1, 512 }
   0x5   :  { %p502_p0 = scmp.ne.s32.totalorder %s769_s1, %s501_s18  ;;  %p505_p1 = scmp.lt.u32.totalorder %s501_s18, %s769_s1 }
   0x7   :  { %p507_p2 = pnand %p505_p1, %p502_p0 }
   0x9   :  { %510 = shalt.err (!%p507_p2)
}
   0xa   :  { %s511_s23 = scalar_lea.vmem %s29_s13, 512  ;;  %p516_p4 = scmp.lt.s32.totalorder %s29_s13, %s29_s13 }
   0xb   :  { %p512_p3 = scmp.ne.s32.totalorder %s29_s13, %s511_s23  ;;  %p517_p5 = scmp.lt.s32.totalorder %s511_s23, %s511_s23 }
   0xd   :  { %p518_p6 = por %p517_p5, %p516_p4 }
   0xf   :  { %p519_p7 = pnand %p518_p6, %p512_p3 }
  0x11   :  { %522 = shalt.err (!%p519_p7)
}
  0x12   :  { %s597_s24 = smov 128   ;;  %s598_s25 = smov 8  }
  0x13   :  { %34 = dma.hbm_to_vmem [thread:$0]  %s769_s1, 512, %s29_s13, [#allocation7], %s597_s24, %s597_s24, %s598_s25  }
  0x14   :  { %s523_s30 = scalar_lea.hbm %s768_s0, 2048 }
  0x15   :  { %p524_p8 = scmp.ne.s32.totalorder %s768_s0, %s523_s30  ;;  %p527_p9 = scmp.lt.u32.totalorder %s523_s30, %s768_s0 }
  0x17   :  { %p529_p10 = pnand %p527_p9, %p524_p8 }
  0x19   :  { %532 = shalt.err (!%p529_p10)
}
  0x1a   :  { %s533_s8 = scalar_lea.vmem %s622_s15, 2048  ;;  %p538_p12 = scmp.lt.s32.totalorder %s622_s15, %s622_s15 }
  0x1b   :  { %p534_p11 = scmp.ne.s32.totalorder %s622_s15, %s533_s8  ;;  %p539_p13 = scmp.lt.s32.totalorder %s533_s8, %s533_s8 }
  0x1d   :  { %p540_p0 = por %p539_p13, %p538_p12 }
  0x1f   :  { %p541_p1 = pnand %p540_p0, %p534_p11 }
  0x21   :  { %544 = shalt.err (!%p541_p1)
}
  0x22   :  { %22 = dma.hbm_to_vmem [thread:$0]  %s768_s0, 2048, %s622_s15, [#allocation4], %s597_s24, %s597_s24, %s598_s25  }
  0x23   :  { %s599_s10 = smov [#allocation8]   ;;  %s545_s14 = scalar_lea.hbm %s770_s2, 16 }
  0x24   :  { %s41_s11 = sshll.u32 %s599_s10, 4  ;;  %p546_p2 = scmp.ne.s32.totalorder %s770_s2, %s545_s14  ;;  %s42_s11 = int_to_ptr.vmem [resolvable:$true] %s41_s11 }
  0x25   :  { %p549_p3 = scmp.lt.u32.totalorder %s545_s14, %s770_s2 }
  0x27   :  { %p551_p4 = pnand %p549_p3, %p546_p2 }
  0x29   :  { %554 = shalt.err (!%p551_p4)
}
  0x2a   :  { %s555_s20 = scalar_lea.vmem %s42_s11, 16  ;;  %s559_s0 = scalar_lea.vmem %s42_s11, 32 }
  0x2b   :  { %p556_p5 = scmp.ne.s32.totalorder %s42_s11, %s555_s20  ;;  %p560_p6 = scmp.lt.s32.totalorder %s42_s11, %s42_s11 }
  0x2c   :  { %p561_p7 = scmp.lt.s32.totalorder %s559_s0, %s555_s20 }
  0x2e   :  { %p562_p8 = por %p561_p7, %p560_p6 }
  0x30   :  { %p563_p9 = pnand %p562_p8, %p556_p5 }
  0x32   :  { %566 = shalt.err (!%p563_p9)
}
  0x33   :  { %44 = dma.hbm_to_vmem [thread:$0]  %s770_s2, 16, %s42_s11, [#allocation7]  }
  0x34   :  { %589 = dma.done.wait [#allocation4], 2048  }
  0x35   :  { %590 = vsyncadd [#allocation4], 4294965248 }
  0x36   :  { %591 = dma.done.wait [#allocation7], 528  }
  0x37   :  { %592 = vsyncadd [#allocation7], 4294966768  ;;  %vm58_vm0 = vcmask 261120   ;;  %v600_v0 = vmov 0.0   ;;  %v107_v1 = vld [vmem:[#allocation6] sm:$0xff]  ;;  %v108_v2 = vld [vmem:[#allocation6 + $0x8] sm:$0xff] }
  0x38   :  { %60 = vst.msk [vmem:[#allocation2 + $0x8] sm:$0xff] %vm58_vm0, %v600_v0  ;;  %59 = vst.msk [vmem:[#allocation2] sm:$0xff] %vm58_vm0, %v600_v0  ;;  %v109_v3 = vld [vmem:[#allocation6 + $0x10] sm:$0xff]  ;;  %v482_v4 = vpack.c.bf16 %v108_v2, %v107_v1  ;;  %v110_v5 = vld [vmem:[#allocation6 + $0x18] sm:$0xff]  ;;  %s601_s2 = smov [#allocation9]  }
  0x39   :  { %61 = vst.msk [vmem:[#allocation2 + $0x10] sm:$0xff] %vm58_vm0, %v600_v0  ;;  %62 = vst.msk [vmem:[#allocation2 + $0x18] sm:$0xff] %vm58_vm0, %v600_v0  ;;  %v91_v6 = vld [vmem:[#allocation3] sm:$0xff]  ;;  %v486_v8 = vpack.c.bf16 %v110_v5, %v109_v3  ;;  %v92_v9 = vld [vmem:[#allocation3 + $0x8] sm:$0xff]  ;;  %s400_s22 = sshll.u32 %s601_s2, 4  ;;  %s401_s22 = int_to_ptr.vmem [resolvable:$true] %s400_s22 }
  0x3a   :  { %63 = vst.msk [vmem:[#allocation2 + $0x20] sm:$0xff] %vm58_vm0, %v600_v0  ;;  %64 = vst.msk [vmem:[#allocation2 + $0x28] sm:$0xff] %vm58_vm0, %v600_v0  ;;  %v99_v7 = vld [vmem:[#allocation3 + $0x40] sm:$0xff]  ;;  %458 = vmatprep.mubr.msk.f32.mxu0 %vm58_vm0, %v91_v6  ;;  %483 = vmatprep.subr.bf16.mxu0 %v482_v4  ;;  %v100_v10 = vld [vmem:[#allocation3 + $0x48] sm:$0xff]  ;;  %s567_s23 = scalar_lea.vmem %s401_s22, 2048  ;;  %p572_p11 = scmp.lt.s32.totalorder %s401_s22, %s401_s22 }
  0x3b   :  { %65 = vst.msk [vmem:[#allocation2 + $0x30] sm:$0xff] %vm58_vm0, %v600_v0  ;;  %66 = vst.msk [vmem:[#allocation2 + $0x38] sm:$0xff] %vm58_vm0, %v600_v0  ;;  %470 = vmatprep.mubr.msk.f32.mxu1 %vm58_vm0, %v99_v7  ;;  %490 = vmatprep.subr.bf16.mxu1 %v482_v4  ;;  %v93_v11 = vld [vmem:[#allocation3 + $0x10] sm:$0xff]  ;;  %v94_v13 = vld [vmem:[#allocation3 + $0x18] sm:$0xff]  ;;  %p568_p10 = scmp.ne.s32.totalorder %s401_s22, %s567_s23  ;;  %p573_p12 = scmp.lt.s32.totalorder %s567_s23, %s567_s23 }
  0x3c   :  { %67 = vst.msk [vmem:[#allocation2 + $0x40] sm:$0xff] %vm58_vm0, %v600_v0  ;;  %68 = vst.msk [vmem:[#allocation2 + $0x48] sm:$0xff] %vm58_vm0, %v600_v0  ;;  %485 = vmatpush3.bf16.msra.mxu0 %v482_v4  ;;  %492 = vmatpush3.bf16.msra.mxu1 %v482_v4  ;;  %v101_v12 = vld [vmem:[#allocation3 + $0x50] sm:$0xff]  ;;  %v102_v14 = vld [vmem:[#allocation3 + $0x58] sm:$0xff] }
  0x3d   :  { %69 = vst.msk [vmem:[#allocation2 + $0x50] sm:$0xff] %vm58_vm0, %v600_v0  ;;  %70 = vst.msk [vmem:[#allocation2 + $0x58] sm:$0xff] %vm58_vm0, %v600_v0  ;;  %487 = vmatprep.subr.bf16.mxu0 %v486_v8  ;;  %491 = vmatprep.subr.bf16.mxu1 %v486_v8  ;;  %v95_v15 = vld [vmem:[#allocation3 + $0x20] sm:$0xff]  ;;  %v96_v17 = vld [vmem:[#allocation3 + $0x28] sm:$0xff]  ;;  %p574_p13 = por %p573_p12, %p572_p11 }
  0x3e   :  { %71 = vst.msk [vmem:[#allocation2 + $0x60] sm:$0xff] %vm58_vm0, %v600_v0  ;;  %72 = vst.msk [vmem:[#allocation2 + $0x68] sm:$0xff] %vm58_vm0, %v600_v0  ;;  %v103_v16 = vld [vmem:[#allocation3 + $0x60] sm:$0xff]  ;;  %v104_v18 = vld [vmem:[#allocation3 + $0x68] sm:$0xff] }
  0x3f   :  { %73 = vst.msk [vmem:[#allocation2 + $0x70] sm:$0xff] %vm58_vm0, %v600_v0  ;;  %74 = vst.msk [vmem:[#allocation2 + $0x78] sm:$0xff] %vm58_vm0, %v600_v0  ;;  %v97_v19 = vld [vmem:[#allocation3 + $0x30] sm:$0xff]  ;;  %v98_v21 = vld [vmem:[#allocation3 + $0x38] sm:$0xff]  ;;  %p575_p0 = pnand %p574_p13, %p568_p10 }
  0x40   :  { %489 = vmatpush3.bf16.msra.mxu0 %v486_v8  ;;  %493 = vmatpush3.bf16.msra.mxu1 %v486_v8  ;;  %v105_v20 = vld [vmem:[#allocation3 + $0x70] sm:$0xff]  ;;  %v106_v22 = vld [vmem:[#allocation3 + $0x78] sm:$0xff]  ;;  %v76_v23 = vld [vmem:[#allocation2 + $0x8] sm:$0xff] }
  0x41   :  { %v75_v25 = vld [vmem:[#allocation2] sm:$0xff]  ;;  %v78_v35 = vld [vmem:[#allocation2 + $0x18] sm:$0xff]  ;;  %v77_v37 = vld [vmem:[#allocation2 + $0x10] sm:$0xff] }
  0x42   :  { %v80_v47 = vld [vmem:[#allocation2 + $0x28] sm:$0xff]  ;;  %v79_v49 = vld [vmem:[#allocation2 + $0x20] sm:$0xff]  ;;  %v82_v58 = vld [vmem:[#allocation2 + $0x38] sm:$0xff] }
  0x43   :  { %459 = vmatmul.mubr.msk.f32.vlgmr.msra.gmra.mrb[0].mxu0 %vm58_vm0, %v92_v9  ;;  %471 = vmatmul.mubr.msk.f32.vlgmr.msra.gmra.mrb[0].mxu1 %vm58_vm0, %v100_v10  ;;  %v84_v24 = vld [vmem:[#allocation2 + $0x48] sm:$0xff]  ;;  %v83_v26 = vld [vmem:[#allocation2 + $0x40] sm:$0xff]  ;;  %v81_v0 = vld [vmem:[#allocation2 + $0x30] sm:$0xff] }
  0x44   :  { %461 = vmatprep.mubr.msk.f32.mxu0 %vm58_vm0, %v93_v11  ;;  %473 = vmatprep.mubr.msk.f32.mxu1 %vm58_vm0, %v101_v12  ;;  %v86_v36 = vld [vmem:[#allocation2 + $0x58] sm:$0xff]  ;;  %v85_v38 = vld [vmem:[#allocation2 + $0x50] sm:$0xff]  ;;  %v709_v51 = vld [vmem:[#allocation8] ss:$0 sm:$0xff] }
  0x45   :  { %v88_v48 = vld [vmem:[#allocation2 + $0x68] sm:$0xff]  ;;  %v87_v50 = vld [vmem:[#allocation2 + $0x60] sm:$0xff] }
  0x46   :  { %v90_v59 = vld [vmem:[#allocation2 + $0x78] sm:$0xff]  ;;  %v89_v5 = vld [vmem:[#allocation2 + $0x70] sm:$0xff] }
  0x47   :  { %462 = vmatmul.mubr.msk.f32.gmra.mrb[2].mxu0 %vm58_vm0, %v94_v13  ;;  %474 = vmatmul.mubr.msk.f32.gmra.mrb[2].mxu1 %vm58_vm0, %v102_v14 }
  0x48   :  { %464 = vmatprep.mubr.msk.f32.mxu0 %vm58_vm0, %v95_v15  ;;  %476 = vmatprep.mubr.msk.f32.mxu1 %vm58_vm0, %v103_v16 }
  0x4b   :  { %465 = vmatmul.mubr.msk.f32.gmra.mrb[4].mxu0 %vm58_vm0, %v96_v17  ;;  %477 = vmatmul.mubr.msk.f32.gmra.mrb[4].mxu1 %vm58_vm0, %v104_v18 }
  0x4c   :  { %467 = vmatprep.mubr.msk.f32.mxu0 %vm58_vm0, %v97_v19  ;;  %479 = vmatprep.mubr.msk.f32.mxu1 %vm58_vm0, %v105_v20 }
  0x4f   :  { %468 = vmatmul.mubr.msk.f32.gmra.mrb[6].mxu0 %vm58_vm0, %v98_v21  ;;  %480 = vmatmul.mubr.msk.f32.gmra.mrb[6].mxu1 %vm58_vm0, %v106_v22 }
 0x116   :  { %v460_v27 = vpop.f32.mrb[0].mxu0  ;;  %v472_v28 = vpop.f32.mrb[0].mxu1 }
 0x117   :  { %v306_v29 = vadd.f32 %v460_v27, %v76_v23  ;;  %v314_v30 = vadd.f32 %v472_v28, %v84_v24  ;;  %v226_v31 = vpop.f32.mrb[1].mxu0  ;;  %v266_v32 = vpop.f32.mrb[1].mxu1 }
 0x118   :  { %v305_v33 = vadd.f32 %v226_v31, %v75_v25  ;;  %v313_v34 = vadd.f32 %v266_v32, %v83_v26 }
 0x119   :  { %322 = vst.msk [vmem:[#allocation2 + $0x8] sm:$0xff] %vm58_vm0, %v306_v29  ;;  %330 = vst.msk [vmem:[#allocation2 + $0x48] sm:$0xff] %vm58_vm0, %v314_v30 }
 0x11a   :  { %321 = vst.msk [vmem:[#allocation2] sm:$0xff] %vm58_vm0, %v305_v33  ;;  %329 = vst.msk [vmem:[#allocation2 + $0x40] sm:$0xff] %vm58_vm0, %v313_v34  ;;  %v463_v39 = vpop.f32.mrb[2].mxu0  ;;  %v475_v40 = vpop.f32.mrb[2].mxu1 }
 0x11b   :  { %v308_v41 = vadd.f32 %v463_v39, %v78_v35  ;;  %v316_v42 = vadd.f32 %v475_v40, %v86_v36  ;;  %v236_v43 = vpop.f32.mrb[3].mxu0  ;;  %v276_v44 = vpop.f32.mrb[3].mxu1 }
 0x11c   :  { %v307_v45 = vadd.f32 %v236_v43, %v77_v37  ;;  %v315_v46 = vadd.f32 %v276_v44, %v85_v38 }
 0x11d   :  { %324 = vst.msk [vmem:[#allocation2 + $0x18] sm:$0xff] %vm58_vm0, %v308_v41  ;;  %332 = vst.msk [vmem:[#allocation2 + $0x58] sm:$0xff] %vm58_vm0, %v316_v42 }
 0x11e   :  { %323 = vst.msk [vmem:[#allocation2 + $0x10] sm:$0xff] %vm58_vm0, %v307_v45  ;;  %331 = vst.msk [vmem:[#allocation2 + $0x50] sm:$0xff] %vm58_vm0, %v315_v46  ;;  %v466_v52 = vpop.f32.mrb[4].mxu0  ;;  %v478_v53 = vpop.f32.mrb[4].mxu1 }
 0x11f   :  { %v310_v54 = vadd.f32 %v466_v52, %v80_v47  ;;  %v318_v55 = vadd.f32 %v478_v53, %v88_v48  ;;  %v246_v56 = vpop.f32.mrb[5].mxu0  ;;  %v286_v57 = vpop.f32.mrb[5].mxu1 }
 0x120   :  { %v341_v60 = vld [vmem:[#allocation2 + $0x8] sm:$0xff]  ;;  %v309_v62 = vadd.f32 %v246_v56, %v79_v49  ;;  %v317_v63 = vadd.f32 %v286_v57, %v87_v50 }
 0x121   :  { %v349_v61 = vld [vmem:[#allocation2 + $0x48] sm:$0xff]  ;;  %v364_v1 = vadd.f32 %v709_v51, %v341_v60  ;;  %v340_v3 = vld [vmem:[#allocation2] sm:$0xff]  ;;  %326 = vst.msk [vmem:[#allocation2 + $0x28] sm:$0xff] %vm58_vm0, %v310_v54  ;;  %334 = vst.msk [vmem:[#allocation2 + $0x68] sm:$0xff] %vm58_vm0, %v318_v55 }
 0x122   :  { %v372_v2 = vadd.f32 %v709_v51, %v349_v61  ;;  %v348_v4 = vld [vmem:[#allocation2 + $0x40] sm:$0xff]  ;;  %v363_v6 = vadd.f32 %v709_v51, %v340_v3  ;;  %325 = vst.msk [vmem:[#allocation2 + $0x20] sm:$0xff] %vm58_vm0, %v309_v62  ;;  %333 = vst.msk [vmem:[#allocation2 + $0x60] sm:$0xff] %vm58_vm0, %v317_v63  ;;  %v469_v8 = vpop.f32.mrb[6].mxu0  ;;  %v481_v9 = vpop.f32.mrb[6].mxu1 }
 0x123   :  { %v371_v7 = vadd.f32 %v709_v51, %v348_v4  ;;  %380 = vst.msk [vmem:[#allocation9 + $0x8] sm:$0xff] %vm58_vm0, %v364_v1  ;;  %v312_v10 = vadd.f32 %v469_v8, %v82_v58  ;;  %v320_v11 = vadd.f32 %v481_v9, %v90_v59  ;;  %v256_v12 = vpop.f32.mrb[7].mxu0  ;;  %v296_v13 = vpop.f32.mrb[7].mxu1 }
 0x124   :  { %388 = vst.msk [vmem:[#allocation9 + $0x48] sm:$0xff] %vm58_vm0, %v372_v2  ;;  %379 = vst.msk [vmem:[#allocation9] sm:$0xff] %vm58_vm0, %v363_v6  ;;  %v343_v14 = vld [vmem:[#allocation2 + $0x18] sm:$0xff]  ;;  %v311_v16 = vadd.f32 %v256_v12, %v81_v0  ;;  %v319_v17 = vadd.f32 %v296_v13, %v89_v5 }
 0x125   :  { %387 = vst.msk [vmem:[#allocation9 + $0x40] sm:$0xff] %vm58_vm0, %v371_v7  ;;  %v351_v15 = vld [vmem:[#allocation2 + $0x58] sm:$0xff]  ;;  %v366_v18 = vadd.f32 %v709_v51, %v343_v14  ;;  %v342_v20 = vld [vmem:[#allocation2 + $0x10] sm:$0xff]  ;;  %328 = vst.msk [vmem:[#allocation2 + $0x38] sm:$0xff] %vm58_vm0, %v312_v10 }
 0x126   :  { %v374_v19 = vadd.f32 %v709_v51, %v351_v15  ;;  %v350_v21 = vld [vmem:[#allocation2 + $0x50] sm:$0xff]  ;;  %336 = vst.msk [vmem:[#allocation2 + $0x78] sm:$0xff] %vm58_vm0, %v320_v11  ;;  %v365_v22 = vadd.f32 %v709_v51, %v342_v20  ;;  %327 = vst.msk [vmem:[#allocation2 + $0x30] sm:$0xff] %vm58_vm0, %v311_v16 }
 0x127   :  { %v373_v23 = vadd.f32 %v709_v51, %v350_v21  ;;  %335 = vst.msk [vmem:[#allocation2 + $0x70] sm:$0xff] %vm58_vm0, %v319_v17  ;;  %382 = vst.msk [vmem:[#allocation9 + $0x18] sm:$0xff] %vm58_vm0, %v366_v18 }
 0x128   :  { %390 = vst.msk [vmem:[#allocation9 + $0x58] sm:$0xff] %vm58_vm0, %v374_v19  ;;  %381 = vst.msk [vmem:[#allocation9 + $0x10] sm:$0xff] %vm58_vm0, %v365_v22  ;;  %v345_v24 = vld [vmem:[#allocation2 + $0x28] sm:$0xff] }
 0x129   :  { %389 = vst.msk [vmem:[#allocation9 + $0x50] sm:$0xff] %vm58_vm0, %v373_v23  ;;  %v353_v25 = vld [vmem:[#allocation2 + $0x68] sm:$0xff]  ;;  %v368_v26 = vadd.f32 %v709_v51, %v345_v24  ;;  %v344_v28 = vld [vmem:[#allocation2 + $0x20] sm:$0xff] }
 0x12a   :  { %v376_v27 = vadd.f32 %v709_v51, %v353_v25  ;;  %v352_v29 = vld [vmem:[#allocation2 + $0x60] sm:$0xff]  ;;  %v367_v30 = vadd.f32 %v709_v51, %v344_v28 }
 0x12b   :  { %v375_v31 = vadd.f32 %v709_v51, %v352_v29  ;;  %384 = vst.msk [vmem:[#allocation9 + $0x28] sm:$0xff] %vm58_vm0, %v368_v26 }
 0x12c   :  { %392 = vst.msk [vmem:[#allocation9 + $0x68] sm:$0xff] %vm58_vm0, %v376_v27  ;;  %383 = vst.msk [vmem:[#allocation9 + $0x20] sm:$0xff] %vm58_vm0, %v367_v30  ;;  %v347_v32 = vld [vmem:[#allocation2 + $0x38] sm:$0xff] }
 0x12d   :  { %391 = vst.msk [vmem:[#allocation9 + $0x60] sm:$0xff] %vm58_vm0, %v375_v31  ;;  %v355_v33 = vld [vmem:[#allocation2 + $0x78] sm:$0xff]  ;;  %v370_v34 = vadd.f32 %v709_v51, %v347_v32  ;;  %v346_v36 = vld [vmem:[#allocation2 + $0x30] sm:$0xff] }
 0x12e   :  { %v378_v35 = vadd.f32 %v709_v51, %v355_v33  ;;  %v354_v37 = vld [vmem:[#allocation2 + $0x70] sm:$0xff]  ;;  %v369_v38 = vadd.f32 %v709_v51, %v346_v36 }
 0x12f   :  { %v377_v39 = vadd.f32 %v709_v51, %v354_v37  ;;  %386 = vst.msk [vmem:[#allocation9 + $0x38] sm:$0xff] %vm58_vm0, %v370_v34 }
 0x130   :  { %394 = vst.msk [vmem:[#allocation9 + $0x78] sm:$0xff] %vm58_vm0, %v378_v35  ;;  %385 = vst.msk [vmem:[#allocation9 + $0x30] sm:$0xff] %vm58_vm0, %v369_v38 }
 0x131   :  { %393 = vst.msk [vmem:[#allocation9 + $0x70] sm:$0xff] %vm58_vm0, %v377_v39 }
 0x132   :  { %578 = shalt.err (!%p575_p0)
}
 0x133   :  { %s579_s28 = scalar_lea.hbm %s771_s3, 2048 }
 0x134   :  { %p580_p1 = scmp.ne.s32.totalorder %s771_s3, %s579_s28  ;;  %p583_p2 = scmp.lt.u32.totalorder %s579_s28, %s771_s3 }
 0x136   :  { %p585_p3 = pnand %p583_p2, %p580_p1 }
 0x138   :  { %588 = shalt.err (!%p585_p3)
}
 0x139   :  { %406 = dma.vmem_to_hbm [thread:$0]  %s401_s22, 2048, %s771_s3, [#allocation5], %s597_s24, %s597_s24, %s598_s25  }
 0x13a   :  { %593 = dma.done.wait [#allocation5], 2048  }
 0x13b   :  { %594 = vsyncadd [#allocation5], 4294965248 }
 0x13c   :  { %410 = vsyncpa [#allocation4], 1 }
 0x13d   :  { %411 = vsyncpa [#allocation7], 1 }
 0x13e   :  { %412 = vsyncpa [#allocation5], 1 }

</bundles_post_ra>
